<compile_context>
chip_gen: v5e
topology: v5e:2x2
jax: 0.10.0
libtpu: 0.0.40
codegen_flags: <defaults>
</compile_context>

<pallas_src>
import functools

import jax
import jax.numpy as jnp
from jax.experimental import pallas as pl
from jax.experimental.pallas import tpu as pltpu

HIDDEN = 100       # true hidden width of the PyTorch module
PAD = 128          # sublane/lane-aligned padded hidden width
TM_DEFAULT = 2048  # batch columns (lanes) per grid step; multiple of 128


def _round_up(v, m):
    return ((v + m - 1) // m) * m


def mlp_kernel(x_ref, w1_ref, b1_ref, w2_ref, b2_ref, w3_ref, b3_ref, o_ref,
               *, matmul_dtype):
    # x_ref : (1, TM)     lane-dense batch slab
    # w1_ref: (PAD, 1)    W1 column (fan_in = 1), zero past HIDDEN
    # b1_ref: (PAD, 1)
    # w2_ref: (PAD, PAD)  W2 (out x in), zero-padded
    # b2_ref: (PAD, 1)
    # w3_ref: (1, PAD)    W3 row (fan_out = 1), zero past HIDDEN
    # b3_ref: (1, 1)
    # o_ref : (1, TM)     lane-dense output slab
    x = x_ref[...]                                               # (1, TM)

    # layer 1 + ReLU: outer-product broadcast on the VPU (K = 1 -> no MXU)
    h = jnp.maximum(w1_ref[...] * x + b1_ref[...], 0.0)          # (PAD, TM)

    # layer 2 + ReLU: the one real MXU matmul  W2 @ h
    h = jnp.dot(w2_ref[...].astype(matmul_dtype), h.astype(matmul_dtype),
                preferred_element_type=jnp.float32)
    h = jnp.maximum(h + b2_ref[...], 0.0)                        # (PAD, TM)

    # layer 3: (1, PAD) @ (PAD, TM) on the MXU -> lane-dense (1, TM) result
    out = jnp.dot(w3_ref[...].astype(matmul_dtype), h.astype(matmul_dtype),
                  preferred_element_type=jnp.float32)
    o_ref[...] = out + b3_ref[...]


def net_forward(x, padded_params, tm=TM_DEFAULT, use_bf16_matmul=False):
    """x: (N, 1) float32. padded_params: dict from pad_params(). Returns (N, 1)."""
    n = x.shape[0]

    # Lane-align the tile and never exceed the (padded) batch.
    tm = max(PAD, min(_round_up(tm, PAD), _round_up(n, PAD)))
    # v7x megacore: keep >= 2 grid steps when the batch allows it so the
    # "parallel" axis shards across both TensorCores.
    if n > PAD and pl.cdiv(n, tm) < 2:
        tm = _round_up(pl.cdiv(n, 2), PAD)
    grid_n = pl.cdiv(n, tm)
    n_pad = grid_n * tm

    # Lane-dense input slab: (N, 1) -> (1, N_pad); tail padded with zeros so
    # every block's contents are well-defined (finite) even past N.
    x_row = jnp.zeros((1, n_pad), jnp.float32).at[0, :n].set(x[:, 0])

    kernel = functools.partial(
        mlp_kernel,
        matmul_dtype=jnp.bfloat16 if use_bf16_matmul else jnp.float32)

    vec_spec = pl.BlockSpec((PAD, 1), lambda i: (0, 0))    # resident column params
    mat_spec = pl.BlockSpec((PAD, PAD), lambda i: (0, 0))  # resident w2
    row_spec = pl.BlockSpec((1, PAD), lambda i: (0, 0))    # resident w3 row
    scl_spec = pl.BlockSpec((1, 1), lambda i: (0, 0))      # resident b3

    out_row = pl.pallas_call(
        kernel,
        out_shape=jax.ShapeDtypeStruct((1, n_pad), jnp.float32),
        grid_spec=pltpu.PrefetchScalarGridSpec(
            num_scalar_prefetch=0,
            grid=(grid_n,),
            in_specs=[
                pl.BlockSpec((1, tm), lambda i: (0, i)),   # x lane slab
                vec_spec, vec_spec,                        # w1 col, b1 col
                mat_spec, vec_spec,                        # w2, b2 col
                row_spec, scl_spec,                        # w3 row, b3
            ],
            out_specs=pl.BlockSpec((1, tm), lambda i: (0, i)),
        ),
        compiler_params=pltpu.CompilerParams(
            dimension_semantics=("parallel",)),
    )(x_row,
      padded_params["w1"], padded_params["b1"],
      padded_params["w2"], padded_params["b2"],
      padded_params["w3"], padded_params["b3"])

    return out_row[0, :n].reshape(n, 1)


def init_params(key):
    """Raw params with PyTorch nn.Linear shapes and default U(-1/sqrt(fan_in)) init."""
    k1, k2, k3, k4, k5, k6 = jax.random.split(key, 6)

    def linear(kw, kb, fan_in, fan_out):
        bound = 1.0 / jnp.sqrt(jnp.float32(fan_in))
        w = jax.random.uniform(kw, (fan_out, fan_in), jnp.float32, -bound, bound)
        b = jax.random.uniform(kb, (fan_out,), jnp.float32, -bound, bound)
        return w, b

    w1, b1 = linear(k1, k2, 1, HIDDEN)        # (100, 1), (100,)
    w2, b2 = linear(k3, k4, HIDDEN, HIDDEN)   # (100, 100), (100,)
    w3, b3 = linear(k5, k6, HIDDEN, 1)        # (1, 100), (1,)
    return {"w1": w1, "b1": b1, "w2": w2, "b2": b2, "w3": w3, "b3": b3}


def pad_params(raw):
    """Zero-pad hidden dims to PAD and lay params out for the transposed kernel."""
    w1 = jnp.zeros((PAD, 1), jnp.float32).at[:HIDDEN, :].set(raw["w1"])            # (128, 1)
    b1 = jnp.zeros((PAD, 1), jnp.float32).at[:HIDDEN, 0].set(raw["b1"])            # (128, 1)
    w2 = jnp.zeros((PAD, PAD), jnp.float32).at[:HIDDEN, :HIDDEN].set(raw["w2"])    # (128, 128)
    b2 = jnp.zeros((PAD, 1), jnp.float32).at[:HIDDEN, 0].set(raw["b2"])            # (128, 1)
    w3 = jnp.zeros((1, PAD), jnp.float32).at[:, :HIDDEN].set(raw["w3"])            # (1, 128)
    b3 = raw["b3"].reshape(1, 1).astype(jnp.float32)                               # (1, 1)
    return {"w1": w1, "b1": b1, "w2": w2, "b2": b2, "w3": w3, "b3": b3}


def reference_forward(x, raw):
    """Plain-JAX reference of the exact PyTorch forward (y = x @ W.T + b)."""
    h = jnp.maximum(x @ raw["w1"].T + raw["b1"], 0.0)
    h = jnp.maximum(h @ raw["w2"].T + raw["b2"], 0.0)
    return h @ raw["w3"].T + raw["b3"]


# TODO(synk): nn.MSELoss and optim.SGD are training-time state of the module,
# not part of the forward pass, so they are intentionally not implemented here.

if __name__ == "__main__":
    key = jax.random.PRNGKey(0)
    pkey, xkey = jax.random.split(key)
    raw = init_params(pkey)
    padded = pad_params(raw)

    # Small curve-fitting batch, deliberately NOT a multiple of 128/TM.
    N = 1000
    x = jax.random.uniform(xkey, (N, 1), jnp.float32, -3.0, 3.0)
    ref = reference_forward(x, raw)

    # f32 path, default tile: the grid-aware clamp yields 2 parallel steps
    # (both v7x TensorCores busy).
    out = jax.block_until_ready(net_forward(x, padded))
    assert out.shape == (N, 1)
    assert jnp.allclose(out, ref, atol=1e-4, rtol=1e-4)

    # f32 path, small tile: exercises a multi-step grid + zero-padded tail.
    out_small = jax.block_until_ready(net_forward(x, padded, tm=128))
    assert jnp.allclose(out_small, ref, atol=1e-4, rtol=1e-4)

    # Optional bf16-operand matmul path (f32 accumulate); looser tolerance.
    out_bf16 = jax.block_until_ready(net_forward(x, padded, use_bf16_matmul=True))
    assert jnp.allclose(out_bf16, ref, atol=2e-1, rtol=2e-1)

    print("KERNEL_OK")
</pallas_src>

<mosaic_0001>
module attributes {stable_mosaic.version = 11 : i64} {
  func.func @mlp_kernel(%arg0: i32, %arg1: memref<1x512xf32, #tpu.memory_space<vmem>>, %arg2: memref<128x1xf32, #tpu.memory_space<vmem>>, %arg3: memref<128x1xf32, #tpu.memory_space<vmem>>, %arg4: memref<128x128xf32, #tpu.memory_space<vmem>>, %arg5: memref<128x1xf32, #tpu.memory_space<vmem>>, %arg6: memref<1x128xf32, #tpu.memory_space<vmem>>, %arg7: memref<1x1xf32, #tpu.memory_space<vmem>>, %arg8: memref<1x512xf32, #tpu.memory_space<vmem>>) attributes {dimension_semantics = [#tpu.dimension_semantics<parallel>], iteration_bounds = array<i64: 2>, scalar_prefetch = 0 : i64, scratch_operands = 0 : i64, tpu.core_type = #tpu.core_type<tc>, window_params = [{transform_indices = @transform_0, window_bounds = array<i64: 1, 512>}, {pipeline_mode = #tpu.pipeline_mode<synchronous>, transform_indices = @transform_1, window_bounds = array<i64: 128, 1>}, {pipeline_mode = #tpu.pipeline_mode<synchronous>, transform_indices = @transform_2, window_bounds = array<i64: 128, 1>}, {pipeline_mode = #tpu.pipeline_mode<synchronous>, transform_indices = @transform_3, window_bounds = array<i64: 128, 128>}, {pipeline_mode = #tpu.pipeline_mode<synchronous>, transform_indices = @transform_4, window_bounds = array<i64: 128, 1>}, {pipeline_mode = #tpu.pipeline_mode<synchronous>, transform_indices = @transform_5, window_bounds = array<i64: 1, 128>}, {pipeline_mode = #tpu.pipeline_mode<synchronous>, transform_indices = @transform_6, window_bounds = array<i64: 1, 1>}, {transform_indices = @transform_7, window_bounds = array<i64: 1, 512>}]} {
    %c0 = arith.constant 0 : index
    %c0_0 = arith.constant 0 : index
    %0 = vector.load %arg1[%c0, %c0_0] : memref<1x512xf32, #tpu.memory_space<vmem>>, vector<1x512xf32>
    %c0_1 = arith.constant 0 : index
    %c0_2 = arith.constant 0 : index
    %1 = vector.load %arg2[%c0_1, %c0_2] : memref<128x1xf32, #tpu.memory_space<vmem>>, vector<128x1xf32>
    %2 = vector.broadcast %1 : vector<128x1xf32> to vector<128x512xf32>
    %3 = vector.broadcast %0 : vector<1x512xf32> to vector<128x512xf32>
    %4 = arith.mulf %2, %3 : vector<128x512xf32>
    %c0_3 = arith.constant 0 : index
    %c0_4 = arith.constant 0 : index
    %5 = vector.load %arg3[%c0_3, %c0_4] : memref<128x1xf32, #tpu.memory_space<vmem>>, vector<128x1xf32>
    %6 = vector.broadcast %5 : vector<128x1xf32> to vector<128x512xf32>
    %7 = arith.addf %4, %6 : vector<128x512xf32>
    %cst = arith.constant 0.000000e+00 : f32
    %8 = vector.broadcast %cst : f32 to vector<128x512xf32>
    %9 = arith.maximumf %7, %8 : vector<128x512xf32>
    %c0_5 = arith.constant 0 : index
    %c0_6 = arith.constant 0 : index
    %10 = vector.load %arg4[%c0_5, %c0_6] : memref<128x128xf32, #tpu.memory_space<vmem>>, vector<128x128xf32>
    %cst_7 = arith.constant dense<0.000000e+00> : vector<128x512xf32>
    %11 = tpu.matmul %10, %9, %cst_7 {dimension_numbers = #tpu.dot_dimension_numbers<[1], [0], [0], [1], [0, 0, 1, 1], [], []>} : vector<128x128xf32>, vector<128x512xf32>, vector<128x512xf32> -> vector<128x512xf32>
    %c0_8 = arith.constant 0 : index
    %c0_9 = arith.constant 0 : index
    %12 = vector.load %arg5[%c0_8, %c0_9] : memref<128x1xf32, #tpu.memory_space<vmem>>, vector<128x1xf32>
    %13 = vector.broadcast %12 : vector<128x1xf32> to vector<128x512xf32>
    %14 = arith.addf %11, %13 : vector<128x512xf32>
    %cst_10 = arith.constant 0.000000e+00 : f32
    %15 = vector.broadcast %cst_10 : f32 to vector<128x512xf32>
    %16 = arith.maximumf %14, %15 : vector<128x512xf32>
    %c0_11 = arith.constant 0 : index
    %c0_12 = arith.constant 0 : index
    %17 = vector.load %arg6[%c0_11, %c0_12] : memref<1x128xf32, #tpu.memory_space<vmem>>, vector<1x128xf32>
    %cst_13 = arith.constant dense<0.000000e+00> : vector<1x512xf32>
    %18 = tpu.matmul %17, %16, %cst_13 {dimension_numbers = #tpu.dot_dimension_numbers<[1], [0], [0], [1], [0, 0, 1, 1], [], []>} : vector<1x128xf32>, vector<128x512xf32>, vector<1x512xf32> -> vector<1x512xf32>
    %c0_14 = arith.constant 0 : index
    %c0_15 = arith.constant 0 : index
    %19 = vector.load %arg7[%c0_14, %c0_15] : memref<1x1xf32, #tpu.memory_space<vmem>>, vector<1x1xf32>
    %20 = vector.broadcast %19 : vector<1x1xf32> to vector<1x512xf32>
    %21 = arith.addf %18, %20 : vector<1x512xf32>
    %c0_16 = arith.constant 0 : index
    %c0_17 = arith.constant 0 : index
    %22 = vector.load %arg8[%c0_16, %c0_17] : memref<1x512xf32, #tpu.memory_space<vmem>>, vector<1x512xf32>
    tpu.vector_store %arg8[%c0_16, %c0_17], %21 {strides = array<i32>} : memref<1x512xf32, #tpu.memory_space<vmem>>, vector<1x512xf32>,
    return
  }
  func.func @transform_0(%arg0: i32) -> (i32, i32) {
    %c0_i32 = arith.constant 0 : i32
    %c0_i32_0 = arith.constant 0 : i32
    return %c0_i32, %arg0 : i32, i32
  }
  func.func @transform_1(%arg0: i32) -> (i32, i32) {
    %c0_i32 = arith.constant 0 : i32
    %c0_i32_0 = arith.constant 0 : i32
    %c0_i32_1 = arith.constant 0 : i32
    return %c0_i32, %c0_i32_0 : i32, i32
  }
  func.func @transform_2(%arg0: i32) -> (i32, i32) {
    %c0_i32 = arith.constant 0 : i32
    %c0_i32_0 = arith.constant 0 : i32
    %c0_i32_1 = arith.constant 0 : i32
    return %c0_i32, %c0_i32_0 : i32, i32
  }
  func.func @transform_3(%arg0: i32) -> (i32, i32) {
    %c0_i32 = arith.constant 0 : i32
    %c0_i32_0 = arith.constant 0 : i32
    %c0_i32_1 = arith.constant 0 : i32
    return %c0_i32, %c0_i32_0 : i32, i32
  }
  func.func @transform_4(%arg0: i32) -> (i32, i32) {
    %c0_i32 = arith.constant 0 : i32
    %c0_i32_0 = arith.constant 0 : i32
    %c0_i32_1 = arith.constant 0 : i32
    return %c0_i32, %c0_i32_0 : i32, i32
  }
  func.func @transform_5(%arg0: i32) -> (i32, i32) {
    %c0_i32 = arith.constant 0 : i32
    %c0_i32_0 = arith.constant 0 : i32
    %c0_i32_1 = arith.constant 0 : i32
    return %c0_i32, %c0_i32_0 : i32, i32
  }
  func.func @transform_6(%arg0: i32) -> (i32, i32) {
    %c0_i32 = arith.constant 0 : i32
    %c0_i32_0 = arith.constant 0 : i32
    %c0_i32_1 = arith.constant 0 : i32
    return %c0_i32, %c0_i32_0 : i32, i32
  }
  func.func @transform_7(%arg0: i32) -> (i32, i32) {
    %c0_i32 = arith.constant 0 : i32
    %c0_i32_0 = arith.constant 0 : i32
    return %c0_i32, %arg0 : i32, i32
  }
}

</mosaic_0001>

<bundles_post_ra>
// kernel: tpu_custom_call.1
= control target key start
LH: loop header
LB: loop body
LE: loop exit
PB: predicated region body
PF: predicated region fallthrough
CT: control target
= control target key end

     0   :  { %s1996_s0 = inlined_call_operand.vmem [shape: f32[1,1024], index: 0, kind: input, shape index: {}]   ;;  %s1997_s1 = inlined_call_operand.vmem [shape: f32[128,1], index: 1, kind: input, shape index: {}]   ;;  %s1998_s2 = inlined_call_operand.vmem [shape: f32[128,1], index: 2, kind: input, shape index: {}]   ;;  %s1999_s3 = inlined_call_operand.vmem [shape: f32[128,128], index: 3, kind: input, shape index: {}]   ;;  %s2000_s4 = inlined_call_operand.vmem [shape: f32[128,1], index: 4, kind: input, shape index: {}]   ;;  %s2001_s5 = inlined_call_operand.vmem [shape: f32[1,128], index: 5, kind: input, shape index: {}]   ;;  %s2002_s6 = inlined_call_operand.<no memory space> [shape: f32[1,1], index: 6, kind: input, shape index: {}]   ;;  %s2003_s7 = inlined_call_operand.hbm [shape: f32[1,1024], index: 7, kind: output, shape index: {}]  }
   0x1   :  { %v12_v0 = vstv %s2002_s6 }
   0x2   :  { %13 = vst [vmem:[#allocation2] sm:$0x1] %v12_v0 }
   0x3   :  { %14 = vsyncpa [#allocation4], 0 }
   0x4   :  { %16 = vsyncpa [#allocation4 + $0x1], 0  ;;  %s1449_s26 = smov 0   ;;  %s1451_s27 = smov 0  }
   0x5   :  { %s1453_s28 = smov 0   ;;  %s1455_s29 = smov 0  }
   0x6 LB: > { %s1287_s6 = sadd.s32 4294967295, %s1403_s29   ;;  %s1288_s30 = sadd.s32 4294967294, %s1403_s29   ;;  %s1403_s29 = sphi %s1455_s29, %s2049_s29   ;;  %s1399_s28 = sphi %s1453_s28, %s2048_s28   ;;  %s1395_s27 = sphi %s1451_s27, %s2047_s27   ;;  %s1391_s26 = sphi %s1449_s26, %s2046_s26  }
   0x7   : > { %s1472_s8 = sadd.s32 1, %s1403_s29   ;;  %s181_s9 = sadd.s32 1, %s1399_s28 }
   0x8   : > { %s178_s10 = ssub.s32 %s1403_s29, %s1472_s8  ;;  %p191_p0 = scmp.ne.s32.totalorder %s1399_s28, %s1395_s27 }
   0x9   : > { %p179_p1 = scmp.eq.s32.totalorder %s178_s10, 0  ;;  %p192_p2 = scmp.eq.s32.totalorder %s1287_s6, 1 }
   0xa   : > { %p197_p3 = scmp.ne.s32.totalorder %s1395_s27, %s1391_s26  ;;  %p198_p4 = scmp.eq.s32.totalorder %s1288_s30, 1 }
   0xb   : > { %s1484_s11 = scalar_select %p179_p1, %s1399_s28, %s181_s9  }
   0xc   : > { %p1486_p5 = por %p192_p2, %p191_p0  ;;  %p1490_p6 = por %p198_p4, %p197_p3 }
   0xd   : > { %p1291_p7 = scmp.ge.s32.totalorder %s1403_s29, 1  ;;  %p242_p8 = scmp.lt.s32.totalorder %s1403_s29, 3 }
   0xf   : > { %p243_p9 = pnand %p1291_p7, %p242_p8 }
  0x11   : > { %246 = sbr.rel (%p243_p9) target bundleno = 657 (0x291), region = 48 }
  0x16   : > { %v463_v1 = vld [vmem:[%s1998_s2 + $0x70] sm:$0xff]  ;;  %v464_v2 = vld [vmem:[%s1998_s2 + $0x78] sm:$0xff]  ;;  %v1405_v4 = vmov 0   ;;  %v292_v5 = vld [vmem:[%s1997_s1 + $0x60] sm:$0xff]  ;;  %s1615_s17 = sshll.u32 %s1287_s6, 2  ;;  %s270_s10 = sand.u32 1, %s1395_s27  }
  0x17   : > { %v295_v3 = vld [vmem:[%s1997_s1 + $0x78] sm:$0xff]  ;;  %1340 = vset.pattern.permute.xlu2 %v1405_v4  ;;  %1339 = vset.pattern.permute.xlu1 %v1405_v4  ;;  %v294_v6 = vld [vmem:[%s1997_s1 + $0x70] sm:$0xff]  ;;  %v293_v7 = vld [vmem:[%s1997_s1 + $0x68] sm:$0xff]  ;;  %p274_p10 = scmp.lt.s32.totalorder %s1615_s17, 7  ;;  %s1292_s14 = sshll.u32 %s270_s10, 2  ;;  %vm1204_vm0 = vcmask 1040384  }
  0x18   : > { %1338 = vset.pattern.permute.xlu0 %v1405_v4  ;;  %537 = vperm.xlu2 %1340, %v463_v1   ;;  %v461_v8 = vld [vmem:[%s1998_s2 + $0x60] sm:$0xff]  ;;  %v462_v9 = vld [vmem:[%s1998_s2 + $0x68] sm:$0xff]  ;;  %v291_v10 = vld [vmem:[%s1997_s1 + $0x58] sm:$0xff]  ;;  %s1227_s18 = scalar_lea.hbm %s2003_s7, %s1615_s17  ;;  %vm1206_vm1 = vcmask 1042434   ;;  %s272_s19 = scalar_lea.vmem [#allocation3], %s1292_s14  ;;  %vm1208_vm2 = vcmask 1041408  }
  0x19   : > { %542 = vperm.xlu1 %1339, %v464_v2   ;;  %373 = vperm.xlu0 %1338, %v295_v3   ;;  %v289_v11 = vld [vmem:[%s1997_s1 + $0x48] sm:$0xff]  ;;  %v460_v12 = vld [vmem:[%s1998_s2 + $0x58] sm:$0xff]  ;;  %v290_v13 = vld [vmem:[%s1997_s1 + $0x50] sm:$0xff]  ;;  %s275_s6 = scalar_select %p274_p10, %s1615_s17, 7 }
  0x1a   : > { %v458_v14 = vld [vmem:[%s1998_s2 + $0x48] sm:$0xff]  ;;  %v459_v15 = vld [vmem:[%s1998_s2 + $0x50] sm:$0xff]  ;;  %v288_v16 = vld [vmem:[%s1997_s1 + $0x40] sm:$0xff]  ;;  %s1229_s20 = sshll.u32 %s272_s19, 4  ;;  %s1231_s21 = sshll.u32 %s1227_s18, 4  ;;  %s1230_s20 = int_to_ptr.vmem [resolvable:$true] %s1229_s20  ;;  %s1232_s21 = int_to_ptr.hbm [resolvable:$true] %s1231_s21 }
  0x1b   : > { %v286_v17 = vld [vmem:[%s1997_s1 + $0x30] sm:$0xff]  ;;  %v457_v18 = vld [vmem:[%s1998_s2 + $0x40] sm:$0xff]  ;;  %v287_v19 = vld [vmem:[%s1997_s1 + $0x38] sm:$0xff]  ;;  %s276_s30 = scalar_lea.vmem %s1996_s0, %s275_s6  ;;  %s1217_s17 = scalar_lea.sflag [#allocation4], %s270_s10 }
  0x1c   : > { %v455_v20 = vld [vmem:[%s1998_s2 + $0x30] sm:$0xff]  ;;  %v456_v21 = vld [vmem:[%s1998_s2 + $0x38] sm:$0xff]  ;;  %v285_v22 = vld [vmem:[%s1997_s1 + $0x28] sm:$0xff]  ;;  %s1355_s22 = sshra.s32 %s1232_s21, 4  ;;  %s1361_s25 = scalar_lea.hbm %s2003_s7, 8  ;;  %s1356_s22 = int_to_ptr.hbm [resolvable:$true] %s1355_s22 }
  0x1d   : > { %v283_v23 = vld [vmem:[%s1997_s1 + $0x18] sm:$0xff]  ;;  %v454_v24 = vld [vmem:[%s1998_s2 + $0x28] sm:$0xff]  ;;  %v284_v25 = vld [vmem:[%s1997_s1 + $0x20] sm:$0xff]  ;;  %s1357_s23 = scalar_lea.hbm %s1356_s22, 4  ;;  %p1362_p0 = scmp.lt.s32.totalorder %s1356_s22, %s2003_s7 }
  0x1e   : > { %v452_v26 = vld [vmem:[%s1998_s2 + $0x18] sm:$0xff]  ;;  %v453_v27 = vld [vmem:[%s1998_s2 + $0x20] sm:$0xff]  ;;  %v282_v28 = vld [vmem:[%s1997_s1 + $0x10] sm:$0xff]  ;;  %p1358_p11 = scmp.ne.s32.totalorder %s1356_s22, %s1357_s23  ;;  %p1363_p1 = scmp.lt.s32.totalorder %s1361_s25, %s1357_s23 }
  0x1f   : > { %v280_v29 = vld [vmem:[%s1997_s1] sm:$0xff]  ;;  %v451_v30 = vld [vmem:[%s1998_s2 + $0x10] sm:$0xff]  ;;  %v281_v31 = vld [vmem:[%s1997_s1 + $0x8] sm:$0xff] }
  0x20   : > { %358 = vperm.xlu2 %1340, %v292_v5   ;;  %v704_v32 = vld [vmem:[%s2000_s4 + $0x78] sm:$0xff]  ;;  %v449_v33 = vld [vmem:[%s1998_s2] sm:$0xff]  ;;  %v450_v34 = vld [vmem:[%s1998_s2 + $0x8] sm:$0xff]  ;;  %p1359_p12 = pnand %p1358_p11, %p1486_p5  ;;  %p1364_p2 = por %p1363_p1, %p1362_p0 }
  0x21   : > { %368 = vperm.xlu0 %1338, %v294_v6   ;;  %363 = vperm.xlu1 %1339, %v293_v7   ;;  %v701_v35 = vld [vmem:[%s2000_s4 + $0x60] sm:$0xff]  ;;  %v702_v36 = vld [vmem:[%s2000_s4 + $0x68] sm:$0xff]  ;;  %v703_v37 = vld [vmem:[%s2000_s4 + $0x70] sm:$0xff] }
  0x22   : > { %v698_v38 = vld [vmem:[%s2000_s4 + $0x48] sm:$0xff]  ;;  %v699_v39 = vld [vmem:[%s2000_s4 + $0x50] sm:$0xff]  ;;  %v700_v40 = vld [vmem:[%s2000_s4 + $0x58] sm:$0xff]  ;;  %p1360_p13 = pneg %p1359_p12 }
  0x23   : > { %v695_v42 = vld [vmem:[%s2000_s4 + $0x30] sm:$0xff]  ;;  %v696_v43 = vld [vmem:[%s2000_s4 + $0x38] sm:$0xff]  ;;  %v697_v44 = vld [vmem:[%s2000_s4 + $0x40] sm:$0xff] }
  0x24   : > { %v692_v46 = vld [vmem:[%s2000_s4 + $0x18] sm:$0xff]  ;;  %v279_v47 = vld [vmem:[%s276_s30] sm:$0xf]  ;;  %v694_v49 = vld [vmem:[%s2000_s4 + $0x28] sm:$0xff]  ;;  %p1365_p3 = pnand %p1364_p2, %p1360_p13 }
  0x25   : > { %v693_v48 = vld [vmem:[%s2000_s4 + $0x20] sm:$0xff]  ;;  %v1640_v50 = vperm.slane %v279_v47, 0  ;;  %v1642_v51 = vperm.slane %v279_v47, 1  ;;  %v1644_v52 = vperm.slane %v279_v47, 2  ;;  %v1646_v53 = vperm.slane %v279_v47, 3  ;;  %v690_v62 = vld [vmem:[%s2000_s4 + $0x8] sm:$0xff] }
  0x26   : > { %v689_v61 = vld [vmem:[%s2000_s4] sm:$0xff]  ;;  %v691_v63 = vld [vmem:[%s2000_s4 + $0x10] sm:$0xff] }
  0x28   : > { %527 = vperm.xlu2 %1340, %v461_v8  }
  0x29   : > { %532 = vperm.xlu0 %1338, %v462_v9   ;;  %353 = vperm.xlu1 %1339, %v291_v10  }
  0x30   : > { %343 = vperm.xlu2 %1340, %v289_v11  }
  0x31   : > { %522 = vperm.xlu1 %1339, %v460_v12   ;;  %348 = vperm.xlu0 %1338, %v290_v13  }
  0x38   : > { %512 = vperm.xlu2 %1340, %v458_v14  }
  0x39   : > { %517 = vperm.xlu0 %1338, %v459_v15   ;;  %338 = vperm.xlu1 %1339, %v288_v16   ;;  %v1110_v15 = vld [vmem:[#allocation2] sm:$0x1] }
  0x40   : > { %328 = vperm.xlu2 %1340, %v286_v17  }
  0x41   : > { %507 = vperm.xlu1 %1339, %v457_v18   ;;  %333 = vperm.xlu0 %1338, %v287_v19  }
  0x48   : > { %497 = vperm.xlu2 %1340, %v455_v20  }
  0x49   : > { %502 = vperm.xlu0 %1338, %v456_v21   ;;  %323 = vperm.xlu1 %1339, %v285_v22  }
  0x50   : > { %313 = vperm.xlu2 %1340, %v283_v23  }
  0x51   : > { %492 = vperm.xlu1 %1339, %v454_v24   ;;  %318 = vperm.xlu0 %1338, %v284_v25  }
  0x58   : > { %482 = vperm.xlu2 %1340, %v452_v26  }
  0x59   : > { %487 = vperm.xlu0 %1338, %v453_v27   ;;  %308 = vperm.xlu1 %1339, %v282_v28  }
  0x60   : > { %298 = vperm.xlu2 %1340, %v280_v29  }
  0x61   : > { %477 = vperm.xlu1 %1339, %v451_v30   ;;  %303 = vperm.xlu0 %1338, %v281_v31  }
  0x68   : > { %782 = vperm.xlu2 %1340, %v704_v32  }
  0x69   : > { %467 = vperm.xlu1 %1339, %v449_v33   ;;  %472 = vperm.xlu0 %1338, %v450_v34  }
  0x70   : > { %767 = vperm.xlu2 %1340, %v701_v35  }
  0x71   : > { %772 = vperm.xlu1 %1339, %v702_v36   ;;  %777 = vperm.xlu0 %1338, %v703_v37  }
  0x72   : > { %v538_v41 = vpop.permute.xlu2 %537 }
  0x78   : > { %752 = vperm.xlu2 %1340, %v698_v38  }
  0x79   : > { %757 = vperm.xlu1 %1339, %v699_v39   ;;  %762 = vperm.xlu0 %1338, %v700_v40  }
  0x7a   : > { %v359_v45 = vpop.permute.xlu2 %358 }
  0x7b   : > { %v433_v20 = vmul.f32 %v1640_v50, %v359_v45  ;;  %v434_v21 = vmul.f32 %v1642_v51, %v359_v45  ;;  %v435_v27 = vmul.f32 %v1644_v52, %v359_v45  ;;  %v436_v28 = vmul.f32 %v1646_v53, %v359_v45 }
  0x80   : > { %737 = vperm.xlu2 %1340, %v695_v42  }
  0x81   : > { %742 = vperm.xlu1 %1339, %v696_v43   ;;  %747 = vperm.xlu0 %1338, %v697_v44  }
  0x82   : > { %v528_v56 = vpop.permute.xlu2 %527 }
  0x83   : > { %v593_v34 = vadd.f32 %v528_v56, %v433_v20  ;;  %v594_v35 = vadd.f32 %v528_v56, %v434_v21  ;;  %v595_v40 = vadd.f32 %v528_v56, %v435_v27 }
  0x85   : > { %v657_v47 = vmax.f32 %v593_v34, 0.0 }
  0x88   : > { %722 = vperm.xlu2 %1340, %v692_v46  }
  0x89   : > { %727 = vperm.xlu1 %1339, %v693_v48   ;;  %732 = vperm.xlu0 %1338, %v694_v49   ;;  %v658_v48 = vmax.f32 %v594_v35, 0.0  ;;  %v659_v49 = vmax.f32 %v595_v40, 0.0 }
  0x8a   : > { %v1665_v14 = vpop.permute.xlu2 %343 }
  0x8b   : > { %v543_v54 = vpop.permute.xlu1 %542  ;;  %v374_v55 = vpop.permute.xlu0 %373 }
  0x8c   : > { %v445_v57 = vmul.f32 %v1640_v50, %v374_v55  ;;  %v446_v58 = vmul.f32 %v1642_v51, %v374_v55  ;;  %v447_v59 = vmul.f32 %v1644_v52, %v374_v55  ;;  %v448_v60 = vmul.f32 %v1646_v53, %v374_v55 }
  0x8e   : > { %v605_v0 = vadd.f32 %v543_v54, %v445_v57  ;;  %v606_v1 = vadd.f32 %v543_v54, %v446_v58  ;;  %v607_v2 = vadd.f32 %v543_v54, %v447_v59  ;;  %v608_v3 = vadd.f32 %v543_v54, %v448_v60 }
  0x90   : > { %707 = vperm.xlu2 %1340, %v689_v61   ;;  %v669_v4 = vmax.f32 %v605_v0, 0.0  ;;  %v670_v5 = vmax.f32 %v606_v1, 0.0  ;;  %v671_v6 = vmax.f32 %v607_v2, 0.0  ;;  %v672_v7 = vmax.f32 %v608_v3, 0.0 }
  0x91   : > { %712 = vperm.xlu1 %1339, %v690_v62   ;;  %717 = vperm.xlu0 %1338, %v691_v63  }
  0x92   : > { %785 = vmatpush.msra.mxu0 %v669_v4  ;;  %850 = vmatpush.msra.mxu1 %v670_v5  ;;  %v513_v46 = vpop.permute.xlu2 %512  ;;  %v421_v5 = vmul.f32 %v1640_v50, %v1665_v14 }
  0x93   : > { %915 = vmatpush.msra.mxu2 %v671_v6  ;;  %980 = vmatpush.msra.mxu3 %v672_v7  ;;  %v369_v8 = vpop.permute.xlu0 %368  ;;  %v364_v9 = vpop.permute.xlu1 %363  ;;  %v422_v6 = vmul.f32 %v1642_v51, %v1665_v14  ;;  %v423_v7 = vmul.f32 %v1644_v52, %v1665_v14 }
  0x94   : > { %v441_v10 = vmul.f32 %v1640_v50, %v369_v8  ;;  %v442_v11 = vmul.f32 %v1642_v51, %v369_v8  ;;  %v443_v12 = vmul.f32 %v1644_v52, %v369_v8  ;;  %v444_v13 = vmul.f32 %v1646_v53, %v369_v8 }
  0x95   : > { %v437_v26 = vmul.f32 %v1640_v50, %v364_v9  ;;  %v438_v29 = vmul.f32 %v1642_v51, %v364_v9  ;;  %v439_v30 = vmul.f32 %v1644_v52, %v364_v9  ;;  %v440_v31 = vmul.f32 %v1646_v53, %v364_v9 }
  0x96   : > { %v601_v16 = vadd.f32 %v538_v41, %v441_v10  ;;  %v602_v17 = vadd.f32 %v538_v41, %v442_v11  ;;  %v603_v18 = vadd.f32 %v538_v41, %v443_v12  ;;  %v604_v19 = vadd.f32 %v538_v41, %v444_v13 }
  0x97   : > { %v596_v41 = vadd.f32 %v528_v56, %v436_v28  ;;  %v424_v8 = vmul.f32 %v1646_v53, %v1665_v14 }
  0x98   : > { %v665_v22 = vmax.f32 %v601_v16, 0.0  ;;  %v666_v23 = vmax.f32 %v602_v17, 0.0  ;;  %v667_v24 = vmax.f32 %v603_v18, 0.0  ;;  %v668_v25 = vmax.f32 %v604_v19, 0.0 }
  0x99   : > { %1113 = vperm.xlu0 %1338, %v1110_v15   ;;  %v660_v54 = vmax.f32 %v596_v41, 0.0  ;;  %v581_v17 = vadd.f32 %v513_v46, %v421_v5  ;;  %v582_v18 = vadd.f32 %v513_v46, %v422_v6 }
  0x9a   : > { %786 = vmatpush.msra.mxu0 %v665_v22  ;;  %851 = vmatpush.msra.mxu1 %v666_v23  ;;  %v329_v9 = vpop.permute.xlu2 %328  ;;  %v583_v23 = vadd.f32 %v513_v46, %v423_v7 }
  0x9b   : > { %916 = vmatpush.msra.mxu2 %v667_v24  ;;  %981 = vmatpush.msra.mxu3 %v668_v25  ;;  %v533_v32 = vpop.permute.xlu0 %532  ;;  %v354_v33 = vpop.permute.xlu1 %353  ;;  %v584_v24 = vadd.f32 %v513_v46, %v424_v8  ;;  %v645_v28 = vmax.f32 %v581_v17, 0.0 }
  0x9c   : > { %v597_v36 = vadd.f32 %v533_v32, %v437_v26  ;;  %v598_v37 = vadd.f32 %v533_v32, %v438_v29  ;;  %v599_v38 = vadd.f32 %v533_v32, %v439_v30  ;;  %v600_v39 = vadd.f32 %v533_v32, %v440_v31 }
  0x9d   : > { %v429_v55 = vmul.f32 %v1640_v50, %v354_v33  ;;  %v430_v57 = vmul.f32 %v1642_v51, %v354_v33  ;;  %v431_v56 = vmul.f32 %v1644_v52, %v354_v33  ;;  %v432_v58 = vmul.f32 %v1646_v53, %v354_v33 }
  0x9e   : > { %v661_v42 = vmax.f32 %v597_v36, 0.0  ;;  %v662_v43 = vmax.f32 %v598_v37, 0.0  ;;  %v663_v44 = vmax.f32 %v599_v38, 0.0  ;;  %v664_v45 = vmax.f32 %v600_v39, 0.0 }
  0x9f   : > { %v646_v29 = vmax.f32 %v582_v18, 0.0  ;;  %v647_v30 = vmax.f32 %v583_v23, 0.0  ;;  %v648_v31 = vmax.f32 %v584_v24, 0.0 }
  0xa0   : > { %787 = vmatpush.msra.mxu0 %v661_v42  ;;  %852 = vmatpush.msra.mxu1 %v662_v43 }
  0xa1   : > { %917 = vmatpush.msra.mxu2 %v663_v44  ;;  %982 = vmatpush.msra.mxu3 %v664_v45 }
  0xa2   : > { %788 = vmatpush.msra.mxu0 %v657_v47  ;;  %853 = vmatpush.msra.mxu1 %v658_v48  ;;  %v498_v38 = vpop.permute.xlu2 %497  ;;  %v409_v47 = vmul.f32 %v1640_v50, %v329_v9  ;;  %v410_v48 = vmul.f32 %v1642_v51, %v329_v9 }
  0xa3   : > { %918 = vmatpush.msra.mxu2 %v659_v49  ;;  %983 = vmatpush.msra.mxu3 %v660_v54  ;;  %v523_v59 = vpop.permute.xlu1 %522  ;;  %v349_v60 = vpop.permute.xlu0 %348 }
  0xa4   : > { %v589_v61 = vadd.f32 %v523_v59, %v429_v55  ;;  %v590_v62 = vadd.f32 %v523_v59, %v430_v57  ;;  %v591_v63 = vadd.f32 %v523_v59, %v431_v56  ;;  %v592_v0 = vadd.f32 %v523_v59, %v432_v58 }
  0xa5   : > { %v425_v10 = vmul.f32 %v1640_v50, %v349_v60  ;;  %v426_v11 = vmul.f32 %v1642_v51, %v349_v60  ;;  %v427_v12 = vmul.f32 %v1644_v52, %v349_v60  ;;  %v428_v13 = vmul.f32 %v1646_v53, %v349_v60 }
  0xa6   : > { %v653_v1 = vmax.f32 %v589_v61, 0.0  ;;  %v654_v2 = vmax.f32 %v590_v62, 0.0  ;;  %v655_v3 = vmax.f32 %v591_v63, 0.0  ;;  %v656_v4 = vmax.f32 %v592_v0, 0.0 }
  0xa7   : > { %v569_v59 = vadd.f32 %v498_v38, %v409_v47  ;;  %v570_v60 = vadd.f32 %v498_v38, %v410_v48  ;;  %v411_v61 = vmul.f32 %v1644_v52, %v329_v9  ;;  %v412_v62 = vmul.f32 %v1646_v53, %v329_v9 }
  0xa8   : > { %789 = vmatpush.msra.mxu0 %v653_v1  ;;  %854 = vmatpush.msra.mxu1 %v654_v2 }
  0xa9   : > { %919 = vmatpush.msra.mxu2 %v655_v3  ;;  %984 = vmatpush.msra.mxu3 %v656_v4  ;;  %v571_v3 = vadd.f32 %v498_v38, %v411_v61  ;;  %v572_v4 = vadd.f32 %v498_v38, %v412_v62 }
  0xaa   : > { %v314_v5 = vpop.permute.xlu2 %313 }
  0xab   : > { %v518_v15 = vpop.permute.xlu0 %517  ;;  %v339_v16 = vpop.permute.xlu1 %338 }
  0xac   : > { %v585_v19 = vadd.f32 %v518_v15, %v425_v10  ;;  %v586_v20 = vadd.f32 %v518_v15, %v426_v11  ;;  %v587_v21 = vadd.f32 %v518_v15, %v427_v12  ;;  %v588_v22 = vadd.f32 %v518_v15, %v428_v13 }
  0xad   : > { %v417_v32 = vmul.f32 %v1640_v50, %v339_v16  ;;  %v418_v33 = vmul.f32 %v1642_v51, %v339_v16  ;;  %v419_v34 = vmul.f32 %v1644_v52, %v339_v16  ;;  %v420_v35 = vmul.f32 %v1646_v53, %v339_v16 }
  0xae   : > { %v649_v14 = vmax.f32 %v585_v19, 0.0  ;;  %v650_v25 = vmax.f32 %v586_v20, 0.0  ;;  %v651_v26 = vmax.f32 %v587_v21, 0.0  ;;  %v652_v27 = vmax.f32 %v588_v22, 0.0 }
  0xaf   : > { %v633_v11 = vmax.f32 %v569_v59, 0.0  ;;  %v634_v12 = vmax.f32 %v570_v60, 0.0  ;;  %v635_v13 = vmax.f32 %v571_v3, 0.0  ;;  %v636_v15 = vmax.f32 %v572_v4, 0.0 }
  0xb0   : > { %790 = vmatpush.msra.mxu0 %v649_v14  ;;  %855 = vmatpush.msra.mxu1 %v650_v25 }
  0xb1   : > { %920 = vmatpush.msra.mxu2 %v651_v26  ;;  %985 = vmatpush.msra.mxu3 %v652_v27 }
  0xb2   : > { %791 = vmatpush.msra.mxu0 %v645_v28  ;;  %856 = vmatpush.msra.mxu1 %v646_v29  ;;  %v483_v28 = vpop.permute.xlu2 %482  ;;  %v397_v29 = vmul.f32 %v1640_v50, %v314_v5 }
  0xb3   : > { %921 = vmatpush.msra.mxu2 %v647_v30  ;;  %986 = vmatpush.msra.mxu3 %v648_v31  ;;  %v508_v36 = vpop.permute.xlu1 %507  ;;  %v334_v37 = vpop.permute.xlu0 %333  ;;  %v398_v30 = vmul.f32 %v1642_v51, %v314_v5 }
  0xb4   : > { %v577_v39 = vadd.f32 %v508_v36, %v417_v32  ;;  %v578_v40 = vadd.f32 %v508_v36, %v418_v33  ;;  %v579_v41 = vadd.f32 %v508_v36, %v419_v34  ;;  %v580_v42 = vadd.f32 %v508_v36, %v420_v35 }
  0xb5   : > { %v413_v49 = vmul.f32 %v1640_v50, %v334_v37  ;;  %v414_v54 = vmul.f32 %v1642_v51, %v334_v37  ;;  %v415_v55 = vmul.f32 %v1644_v52, %v334_v37  ;;  %v416_v57 = vmul.f32 %v1646_v53, %v334_v37 }
  0xb6   : > { %v641_v43 = vmax.f32 %v577_v39, 0.0  ;;  %v642_v44 = vmax.f32 %v578_v40, 0.0  ;;  %v643_v45 = vmax.f32 %v579_v41, 0.0  ;;  %v644_v46 = vmax.f32 %v580_v42, 0.0 }
  0xb7   : > { %v557_v37 = vadd.f32 %v483_v28, %v397_v29  ;;  %v558_v38 = vadd.f32 %v483_v28, %v398_v30  ;;  %v399_v39 = vmul.f32 %v1644_v52, %v314_v5  ;;  %v400_v40 = vmul.f32 %v1646_v53, %v314_v5 }
  0xb8   : > { %792 = vmatpush.msra.mxu0 %v641_v43  ;;  %857 = vmatpush.msra.mxu1 %v642_v44 }
  0xb9   : > { %922 = vmatpush.msra.mxu2 %v643_v45  ;;  %987 = vmatpush.msra.mxu3 %v644_v46  ;;  %v559_v45 = vadd.f32 %v483_v28, %v399_v39  ;;  %v560_v46 = vadd.f32 %v483_v28, %v400_v40  ;;  %v680_v39 = vld [vmem:[%s1999_s3 + $0x38] sm:$0xff]  ;;  %v681_v40 = vld [vmem:[%s1999_s3 + $0x40] sm:$0xff] }
  0xbb   : > { %v503_v56 = vpop.permute.xlu0 %502  ;;  %v324_v58 = vpop.permute.xlu1 %323 }
  0xbc   : > { %v573_v63 = vadd.f32 %v503_v56, %v413_v49  ;;  %v574_v0 = vadd.f32 %v503_v56, %v414_v54  ;;  %v575_v1 = vadd.f32 %v503_v56, %v415_v55  ;;  %v576_v2 = vadd.f32 %v503_v56, %v416_v57 }
  0xbd   : > { %v405_v9 = vmul.f32 %v1640_v50, %v324_v58  ;;  %v406_v16 = vmul.f32 %v1642_v51, %v324_v58  ;;  %v407_v17 = vmul.f32 %v1644_v52, %v324_v58  ;;  %v408_v18 = vmul.f32 %v1646_v53, %v324_v58 }
  0xbe   : > { %v637_v6 = vmax.f32 %v573_v63, 0.0  ;;  %v638_v7 = vmax.f32 %v574_v0, 0.0  ;;  %v639_v8 = vmax.f32 %v575_v1, 0.0  ;;  %v640_v10 = vmax.f32 %v576_v2, 0.0 }
  0xbf   : > { %v621_v55 = vmax.f32 %v557_v37, 0.0  ;;  %v622_v57 = vmax.f32 %v558_v38, 0.0  ;;  %v623_v56 = vmax.f32 %v559_v45, 0.0  ;;  %v624_v58 = vmax.f32 %v560_v46, 0.0  ;;  %v678_v37 = vld [vmem:[%s1999_s3 + $0x28] sm:$0xff]  ;;  %v679_v38 = vld [vmem:[%s1999_s3 + $0x30] sm:$0xff] }
  0xc0   : > { %793 = vmatpush.msra.mxu0 %v637_v6  ;;  %858 = vmatpush.msra.mxu1 %v638_v7  ;;  %v686_v45 = vld [vmem:[%s1999_s3 + $0x68] sm:$0xff]  ;;  %v687_v46 = vld [vmem:[%s1999_s3 + $0x70] sm:$0xff] }
  0xc1   : > { %923 = vmatpush.msra.mxu2 %v639_v8  ;;  %988 = vmatpush.msra.mxu3 %v640_v10  ;;  %v299_v10 = vpop.permute.xlu2 %298 }
  0xc2   : > { %794 = vmatpush.msra.mxu0 %v633_v11  ;;  %859 = vmatpush.msra.mxu1 %v634_v12 }
  0xc3   : > { %924 = vmatpush.msra.mxu2 %v635_v13  ;;  %989 = vmatpush.msra.mxu3 %v636_v15  ;;  %v493_v19 = vpop.permute.xlu1 %492  ;;  %v319_v20 = vpop.permute.xlu0 %318 }
  0xc4   : > { %v565_v21 = vadd.f32 %v493_v19, %v405_v9  ;;  %v566_v22 = vadd.f32 %v493_v19, %v406_v16  ;;  %v567_v23 = vadd.f32 %v493_v19, %v407_v17  ;;  %v568_v24 = vadd.f32 %v493_v19, %v408_v18 }
  0xc5   : > { %v401_v31 = vmul.f32 %v1640_v50, %v319_v20  ;;  %v402_v32 = vmul.f32 %v1642_v51, %v319_v20  ;;  %v403_v33 = vmul.f32 %v1644_v52, %v319_v20  ;;  %v404_v34 = vmul.f32 %v1646_v53, %v319_v20 }
  0xc6   : > { %v629_v14 = vmax.f32 %v565_v21, 0.0  ;;  %v630_v25 = vmax.f32 %v566_v22, 0.0  ;;  %v631_v26 = vmax.f32 %v567_v23, 0.0  ;;  %v632_v27 = vmax.f32 %v568_v24, 0.0 }
  0xc7   : > { %v385_v17 = vmul.f32 %v1640_v50, %v299_v10  ;;  %v386_v18 = vmul.f32 %v1642_v51, %v299_v10  ;;  %v387_v19 = vmul.f32 %v1644_v52, %v299_v10  ;;  %v388_v20 = vmul.f32 %v1646_v53, %v299_v10 }
  0xc8   : > { %795 = vmatpush.msra.mxu0 %v629_v14  ;;  %860 = vmatpush.msra.mxu1 %v630_v25 }
  0xc9   : > { %925 = vmatpush.msra.mxu2 %v631_v26  ;;  %990 = vmatpush.msra.mxu3 %v632_v27 }
  0xcb   : > { %v488_v35 = vpop.permute.xlu0 %487  ;;  %v309_v36 = vpop.permute.xlu1 %308 }
  0xcc   : > { %v561_v41 = vadd.f32 %v488_v35, %v401_v31  ;;  %v562_v42 = vadd.f32 %v488_v35, %v402_v32  ;;  %v563_v43 = vadd.f32 %v488_v35, %v403_v33  ;;  %v564_v44 = vadd.f32 %v488_v35, %v404_v34  ;;  %v673_v32 = vld [vmem:[%s1999_s3] sm:$0xff]  ;;  %v674_v33 = vld [vmem:[%s1999_s3 + $0x8] sm:$0xff]  ;;  %v675_v34 = vld [vmem:[%s1999_s3 + $0x10] sm:$0xff] }
  0xcd   : > { %v393_v59 = vmul.f32 %v1640_v50, %v309_v36  ;;  %v394_v60 = vmul.f32 %v1642_v51, %v309_v36  ;;  %v395_v61 = vmul.f32 %v1644_v52, %v309_v36  ;;  %v396_v62 = vmul.f32 %v1646_v53, %v309_v36  ;;  %v676_v35 = vld [vmem:[%s1999_s3 + $0x18] sm:$0xff]  ;;  %v677_v36 = vld [vmem:[%s1999_s3 + $0x20] sm:$0xff] }
  0xce   : > { %v625_v47 = vmax.f32 %v561_v41, 0.0  ;;  %v626_v48 = vmax.f32 %v562_v42, 0.0  ;;  %v627_v49 = vmax.f32 %v563_v43, 0.0  ;;  %v628_v54 = vmax.f32 %v564_v44, 0.0  ;;  %v682_v41 = vld [vmem:[%s1999_s3 + $0x48] sm:$0xff]  ;;  %v683_v42 = vld [vmem:[%s1999_s3 + $0x50] sm:$0xff] }
  0xcf   : > { %v684_v43 = vld [vmem:[%s1999_s3 + $0x58] sm:$0xff]  ;;  %v685_v44 = vld [vmem:[%s1999_s3 + $0x60] sm:$0xff] }
  0xd0   : > { %796 = vmatpush.msra.mxu0 %v625_v47  ;;  %861 = vmatpush.msra.mxu1 %v626_v48  ;;  %v688_v47 = vld [vmem:[%s1999_s3 + $0x78] sm:$0xff] }
  0xd1   : > { %926 = vmatpush.msra.mxu2 %v627_v49  ;;  %991 = vmatpush.msra.mxu3 %v628_v54 }
  0xd2   : > { %797 = vmatpush.msra.mxu0 %v621_v55  ;;  %862 = vmatpush.msra.mxu1 %v622_v57 }
  0xd3   : > { %927 = vmatpush.msra.mxu2 %v623_v56  ;;  %992 = vmatpush.msra.mxu3 %v624_v58  ;;  %v478_v63 = vpop.permute.xlu1 %477  ;;  %v304_v0 = vpop.permute.xlu0 %303 }
  0xd4   : > { %v553_v1 = vadd.f32 %v478_v63, %v393_v59  ;;  %v554_v2 = vadd.f32 %v478_v63, %v394_v60  ;;  %v555_v3 = vadd.f32 %v478_v63, %v395_v61  ;;  %v556_v4 = vadd.f32 %v478_v63, %v396_v62 }
  0xd5   : > { %v389_v11 = vmul.f32 %v1640_v50, %v304_v0  ;;  %v390_v12 = vmul.f32 %v1642_v51, %v304_v0  ;;  %v391_v13 = vmul.f32 %v1644_v52, %v304_v0  ;;  %v392_v15 = vmul.f32 %v1646_v53, %v304_v0 }
  0xd6   : > { %v617_v5 = vmax.f32 %v553_v1, 0.0  ;;  %v618_v6 = vmax.f32 %v554_v2, 0.0  ;;  %v619_v7 = vmax.f32 %v555_v3, 0.0  ;;  %v620_v8 = vmax.f32 %v556_v4, 0.0 }
  0xd8   : > { %798 = vmatpush.msra.mxu0 %v617_v5  ;;  %863 = vmatpush.msra.mxu1 %v618_v6 }
  0xd9   : > { %928 = vmatpush.msra.mxu2 %v619_v7  ;;  %993 = vmatpush.msra.mxu3 %v620_v8 }
  0xdb   : > { %v468_v9 = vpop.permute.xlu1 %467  ;;  %v473_v16 = vpop.permute.xlu0 %472 }
  0xdc   : > { %v549_v21 = vadd.f32 %v473_v16, %v389_v11  ;;  %v550_v22 = vadd.f32 %v473_v16, %v390_v12  ;;  %v551_v23 = vadd.f32 %v473_v16, %v391_v13  ;;  %v552_v24 = vadd.f32 %v473_v16, %v392_v15 }
  0xdd   : > { %v545_v14 = vadd.f32 %v468_v9, %v385_v17  ;;  %v546_v25 = vadd.f32 %v468_v9, %v386_v18  ;;  %v547_v26 = vadd.f32 %v468_v9, %v387_v19  ;;  %v548_v27 = vadd.f32 %v468_v9, %v388_v20 }
  0xde   : > { %v613_v28 = vmax.f32 %v549_v21, 0.0  ;;  %v614_v29 = vmax.f32 %v550_v22, 0.0  ;;  %v615_v30 = vmax.f32 %v551_v23, 0.0  ;;  %v616_v31 = vmax.f32 %v552_v24, 0.0 }
  0xdf   : > { %v609_v50 = vmax.f32 %v545_v14, 0.0  ;;  %v610_v51 = vmax.f32 %v546_v25, 0.0  ;;  %v611_v52 = vmax.f32 %v547_v26, 0.0  ;;  %v612_v53 = vmax.f32 %v548_v27, 0.0 }
  0xe0   : > { %799 = vmatpush.msra.mxu0 %v613_v28  ;;  %864 = vmatpush.msra.mxu1 %v614_v29 }
  0xe1   : > { %929 = vmatpush.msra.mxu2 %v615_v30  ;;  %994 = vmatpush.msra.mxu3 %v616_v31 }
  0xe2   : > { %800 = vmatpush.msra.mxu0 %v609_v50  ;;  %865 = vmatpush.msra.mxu1 %v610_v51 }
  0xe3   : > { %930 = vmatpush.msra.mxu2 %v611_v52  ;;  %995 = vmatpush.msra.mxu3 %v612_v53 }
  0xe4   : > { %801 = vmatmul.f32.vlgmr.msra.gmra.mxu0 %v673_v32  ;;  %866 = vmatmul.f32.vlgmr.msra.gmra.mxu1 %v673_v32 }
  0xe5   : > { %931 = vmatmul.f32.vlgmr.msra.gmra.mxu2 %v673_v32  ;;  %996 = vmatmul.f32.vlgmr.msra.gmra.mxu3 %v673_v32 }
  0xec   : > { %804 = vmatmul.f32.gmra.mxu0 %v674_v33  ;;  %869 = vmatmul.f32.gmra.mxu1 %v674_v33 }
  0xed   : > { %934 = vmatmul.f32.gmra.mxu2 %v674_v33  ;;  %999 = vmatmul.f32.gmra.mxu3 %v674_v33 }
  0xf4   : > { %807 = vmatmul.f32.gmra.mxu0 %v675_v34  ;;  %872 = vmatmul.f32.gmra.mxu1 %v675_v34 }
  0xf5   : > { %937 = vmatmul.f32.gmra.mxu2 %v675_v34  ;;  %1002 = vmatmul.f32.gmra.mxu3 %v675_v34  ;;  %v783_v34 = vpop.permute.xlu2 %782 }
  0xfc   : > { %810 = vmatmul.f32.gmra.mxu0 %v676_v35  ;;  %875 = vmatmul.f32.gmra.mxu1 %v676_v35 }
  0xfd   : > { %940 = vmatmul.f32.gmra.mxu2 %v676_v35  ;;  %1005 = vmatmul.f32.gmra.mxu3 %v676_v35  ;;  %v778_v35 = vpop.permute.xlu0 %777 }
 0x104   : > { %813 = vmatmul.f32.gmra.mxu0 %v677_v36  ;;  %878 = vmatmul.f32.gmra.mxu1 %v677_v36 }
 0x105   : > { %943 = vmatmul.f32.gmra.mxu2 %v677_v36  ;;  %1008 = vmatmul.f32.gmra.mxu3 %v677_v36 }
 0x10c   : > { %816 = vmatmul.f32.gmra.mxu0 %v678_v37  ;;  %881 = vmatmul.f32.gmra.mxu1 %v678_v37 }
 0x10d   : > { %946 = vmatmul.f32.gmra.mxu2 %v678_v37  ;;  %1011 = vmatmul.f32.gmra.mxu3 %v678_v37 }
 0x114   : > { %819 = vmatmul.f32.gmra.mxu0 %v679_v38  ;;  %884 = vmatmul.f32.gmra.mxu1 %v679_v38 }
 0x115   : > { %949 = vmatmul.f32.gmra.mxu2 %v679_v38  ;;  %1014 = vmatmul.f32.gmra.mxu3 %v679_v38 }
 0x11c   : > { %822 = vmatmul.f32.gmra.mxu0 %v680_v39  ;;  %887 = vmatmul.f32.gmra.mxu1 %v680_v39 }
 0x11d   : > { %952 = vmatmul.f32.gmra.mxu2 %v680_v39  ;;  %1017 = vmatmul.f32.gmra.mxu3 %v680_v39 }
 0x124   : > { %825 = vmatmul.f32.gmra.mxu0 %v681_v40  ;;  %890 = vmatmul.f32.gmra.mxu1 %v681_v40 }
 0x125   : > { %955 = vmatmul.f32.gmra.mxu2 %v681_v40  ;;  %1020 = vmatmul.f32.gmra.mxu3 %v681_v40  ;;  %v773_v40 = vpop.permute.xlu1 %772 }
 0x12c   : > { %828 = vmatmul.f32.gmra.mxu0 %v682_v41  ;;  %893 = vmatmul.f32.gmra.mxu1 %v682_v41 }
 0x12d   : > { %958 = vmatmul.f32.gmra.mxu2 %v682_v41  ;;  %1023 = vmatmul.f32.gmra.mxu3 %v682_v41  ;;  %v768_v41 = vpop.permute.xlu2 %767 }
 0x134   : > { %831 = vmatmul.f32.gmra.mxu0 %v683_v42  ;;  %896 = vmatmul.f32.gmra.mxu1 %v683_v42 }
 0x135   : > { %961 = vmatmul.f32.gmra.mxu2 %v683_v42  ;;  %1026 = vmatmul.f32.gmra.mxu3 %v683_v42 }
 0x13c   : > { %834 = vmatmul.f32.gmra.mxu0 %v684_v43  ;;  %899 = vmatmul.f32.gmra.mxu1 %v684_v43 }
 0x13d   : > { %964 = vmatmul.f32.gmra.mxu2 %v684_v43  ;;  %1029 = vmatmul.f32.gmra.mxu3 %v684_v43 }
 0x144   : > { %837 = vmatmul.f32.gmra.mxu0 %v685_v44  ;;  %902 = vmatmul.f32.gmra.mxu1 %v685_v44 }
 0x145   : > { %967 = vmatmul.f32.gmra.mxu2 %v685_v44  ;;  %1032 = vmatmul.f32.gmra.mxu3 %v685_v44 }
 0x14c   : > { %840 = vmatmul.f32.gmra.mxu0 %v686_v45  ;;  %905 = vmatmul.f32.gmra.mxu1 %v686_v45 }
 0x14d   : > { %970 = vmatmul.f32.gmra.mxu2 %v686_v45  ;;  %1035 = vmatmul.f32.gmra.mxu3 %v686_v45 }
 0x154   : > { %843 = vmatmul.f32.gmra.mxu0 %v687_v46  ;;  %908 = vmatmul.f32.gmra.mxu1 %v687_v46 }
 0x155   : > { %973 = vmatmul.f32.gmra.mxu2 %v687_v46  ;;  %1038 = vmatmul.f32.gmra.mxu3 %v687_v46  ;;  %v1863_v46 = vpop.permute.xlu0 %762 }
 0x15c   : > { %846 = vmatmul.f32.gmra.mxu0 %v688_v47  ;;  %911 = vmatmul.f32.gmra.mxu1 %v688_v47 }
 0x15d   : > { %976 = vmatmul.f32.gmra.mxu2 %v688_v47  ;;  %1041 = vmatmul.f32.gmra.mxu3 %v688_v47  ;;  %v1865_v47 = vpop.permute.xlu1 %757 }
 0x161   : > { %v1775_v48 = vpop.f32.mrf.mxu0  ;;  %v1777_v49 = vpop.f32.mrf.mxu1 }
 0x162   : > { %2006 = vst [vmem:[#allocation6_spill] sm:$0xff] %v1775_v48 }
 0x163   : > { %2007 = vst [vmem:[#allocation7_spill] sm:$0xff] %v1777_v49 }
 0x168   : > { %v1779_v54 = vpop.f32.mrf.mxu2  ;;  %v1781_v55 = vpop.f32.mrf.mxu3 }
 0x169   : > { %2008 = vst [vmem:[#allocation8_spill] sm:$0xff] %v1779_v54  ;;  %v1783_v57 = vpop.f32.mrf.mxu0  ;;  %v1785_v56 = vpop.f32.mrf.mxu1 }
 0x16a   : > { %2009 = vst [vmem:[#allocation9_spill] sm:$0xff] %v1781_v55  ;;  %v1867_v55 = vpop.permute.xlu2 %752 }
 0x16b   : > { %2010 = vst [vmem:[#allocation10_spill] sm:$0xff] %v1783_v57  ;;  %v1869_v57 = vpop.permute.xlu0 %747 }
 0x16c   : > { %2011 = vst [vmem:[#allocation11_spill] sm:$0xff] %v1785_v56 }
 0x170   : > { %v1787_v58 = vpop.f32.mrf.mxu2  ;;  %v1789_v59 = vpop.f32.mrf.mxu3 }
 0x171   : > { %2012 = vst [vmem:[#allocation12_spill] sm:$0xff] %v1787_v58  ;;  %v1791_v60 = vpop.f32.mrf.mxu0  ;;  %v1793_v61 = vpop.f32.mrf.mxu1 }
 0x172   : > { %2013 = vst [vmem:[#allocation13_spill] sm:$0xff] %v1789_v59 }
 0x173   : > { %2014 = vst [vmem:[#allocation14_spill] sm:$0xff] %v1791_v60 }
 0x174   : > { %2015 = vst [vmem:[#allocation15_spill] sm:$0xff] %v1793_v61 }
 0x178   : > { %v1795_v62 = vpop.f32.mrf.mxu2  ;;  %v1797_v63 = vpop.f32.mrf.mxu3 }
 0x179   : > { %2016 = vst [vmem:[#allocation16_spill] sm:$0xff] %v1795_v62  ;;  %v1799_v0 = vpop.f32.mrf.mxu0  ;;  %v1801_v1 = vpop.f32.mrf.mxu1 }
 0x17a   : > { %2017 = vst [vmem:[#allocation17_spill] sm:$0xff] %v1797_v63 }
 0x180   : > { %v1803_v2 = vpop.f32.mrf.mxu2  ;;  %v1805_v3 = vpop.f32.mrf.mxu3 }
 0x181   : > { %2018 = vst [vmem:[#allocation18_spill] sm:$0xff] %v1803_v2  ;;  %v1807_v4 = vpop.f32.mrf.mxu0  ;;  %v1809_v5 = vpop.f32.mrf.mxu1 }
 0x182   : > { %2019 = vst [vmem:[#allocation19_spill] sm:$0xff] %v1805_v3 }
 0x188   : > { %v1811_v6 = vpop.f32.mrf.mxu2  ;;  %v1813_v7 = vpop.f32.mrf.mxu3 }
 0x189   : > { %2020 = vst [vmem:[#allocation20_spill] sm:$0xff] %v1811_v6  ;;  %v1815_v8 = vpop.f32.mrf.mxu0  ;;  %v1817_v10 = vpop.f32.mrf.mxu1 }
 0x18a   : > { %2021 = vst [vmem:[#allocation21_spill] sm:$0xff] %v1813_v7 }
 0x190   : > { %v1819_v11 = vpop.f32.mrf.mxu2  ;;  %v1821_v12 = vpop.f32.mrf.mxu3 }
 0x191   : > { %2022 = vst [vmem:[#allocation22_spill] sm:$0xff] %v1819_v11  ;;  %v1823_v13 = vpop.f32.mrf.mxu0  ;;  %v1825_v15 = vpop.f32.mrf.mxu1 }
 0x192   : > { %2023 = vst [vmem:[#allocation23_spill] sm:$0xff] %v1821_v12 }
 0x198   : > { %v1827_v9 = vpop.f32.mrf.mxu2  ;;  %v1829_v16 = vpop.f32.mrf.mxu3 }
 0x199   : > { %2024 = vst [vmem:[#allocation24_spill] sm:$0xff] %v1827_v9  ;;  %v1831_v17 = vpop.f32.mrf.mxu0  ;;  %v1833_v18 = vpop.f32.mrf.mxu1 }
 0x19a   : > { %2025 = vst [vmem:[#allocation25_spill] sm:$0xff] %v1829_v16  ;;  %v1871_v16 = vpop.permute.xlu1 %742 }
 0x1a0   : > { %v1835_v19 = vpop.f32.mrf.mxu2  ;;  %v1837_v20 = vpop.f32.mrf.mxu3 }
 0x1a1   : > { %v1839_v21 = vpop.f32.mrf.mxu0  ;;  %v1841_v22 = vpop.f32.mrf.mxu1 }
 0x1a8   : > { %v1843_v23 = vpop.f32.mrf.mxu2  ;;  %v1845_v24 = vpop.f32.mrf.mxu3 }
 0x1a9   : > { %v1847_v14 = vpop.f32.mrf.mxu0  ;;  %v1849_v25 = vpop.f32.mrf.mxu1 }
 0x1b0   : > { %v1851_v26 = vpop.f32.mrf.mxu2  ;;  %v1853_v27 = vpop.f32.mrf.mxu3 }
 0x1b1   : > { %v832_v28 = vpop.f32.mrf.mxu0  ;;  %v897_v29 = vpop.f32.mrf.mxu1 }
 0x1b8   : > { %v1855_v30 = vpop.f32.mrf.mxu2  ;;  %v1857_v31 = vpop.f32.mrf.mxu3 }
 0x1b9   : > { %v835_v50 = vpop.f32.mrf.mxu0  ;;  %v900_v51 = vpop.f32.mrf.mxu1 }
 0x1ba   : > { %v836_v9 = vadd.f32 %v835_v50, %v1863_v46 }
 0x1c0   : > { %v1859_v52 = vpop.f32.mrf.mxu2  ;;  %v1861_v53 = vpop.f32.mrf.mxu3 }
 0x1c1   : > { %v838_v32 = vpop.f32.mrf.mxu0  ;;  %v903_v33 = vpop.f32.mrf.mxu1 }
 0x1c2   : > { %v839_v12 = vadd.f32 %v838_v32, %v768_v41  ;;  %v904_v11 = vadd.f32 %v903_v33, %v768_v41 }
 0x1c4   : > { %v1093_v33 = vmax.f32 %v839_v12, 0.0  ;;  %v1094_v50 = vmax.f32 %v904_v11, 0.0 }
 0x1c8   : > { %v968_v36 = vpop.f32.mrf.mxu2  ;;  %v1033_v37 = vpop.f32.mrf.mxu3 }
 0x1c9   : > { %v841_v38 = vpop.f32.mrf.mxu0  ;;  %v906_v39 = vpop.f32.mrf.mxu1 }
 0x1ca   : > { %v842_v48 = vadd.f32 %v841_v38, %v773_v40  ;;  %v907_v7 = vadd.f32 %v906_v39, %v773_v40 }
 0x1d0   : > { %v971_v42 = vpop.f32.mrf.mxu2  ;;  %v1036_v43 = vpop.f32.mrf.mxu3 }
 0x1d1   : > { %v844_v44 = vpop.f32.mrf.mxu0  ;;  %v909_v45 = vpop.f32.mrf.mxu1 }
 0x1d2   : > { %v845_v62 = vadd.f32 %v844_v44, %v778_v35  ;;  %v910_v3 = vadd.f32 %v909_v45, %v778_v35  ;;  %v901_v44 = vadd.f32 %v900_v51, %v1863_v46 }
 0x1d4   : > { %v1101_v61 = vmax.f32 %v845_v62, 0.0  ;;  %v1102_v60 = vmax.f32 %v910_v3, 0.0 }
 0x1d8   : > { %v974_v54 = vpop.f32.mrf.mxu2  ;;  %v1039_v59 = vpop.f32.mrf.mxu3 }
 0x1d9   : > { %v847_v58 = vpop.f32.mrf.mxu0  ;;  %v912_v63 = vpop.f32.mrf.mxu1  ;;  %v1040_v32 = vadd.f32 %v1039_v59, %v778_v35  ;;  %v1089_v59 = vmax.f32 %v836_v9, 0.0 }
 0x1da   : > { %v848_v2 = vadd.f32 %v847_v58, %v783_v34  ;;  %v913_v49 = vadd.f32 %v912_v63, %v783_v34  ;;  %v1097_v58 = vmax.f32 %v842_v48, 0.0  ;;  %v1098_v63 = vmax.f32 %v907_v7, 0.0  ;;  %v1887_v9 = vpop.permute.xlu0 %732 }
 0x1db   : > { %v972_v48 = vadd.f32 %v971_v42, %v773_v40  ;;  %v1037_v7 = vadd.f32 %v1036_v43, %v773_v40  ;;  %v1104_v11 = vmax.f32 %v1040_v32, 0.0 }
 0x1dc   : > { %v1105_v6 = vmax.f32 %v848_v2, 0.0  ;;  %v1106_v56 = vmax.f32 %v913_v49, 0.0  ;;  %v1875_v49 = vpop.permute.xlu2 %737  ;;  %v975_v2 = vadd.f32 %v974_v54, %v778_v35  ;;  %v895_v54 = vadd.f32 %v1849_v25, %v1867_v55 }
 0x1dd   : > { %v892_v35 = vadd.f32 %v1841_v22, %v1869_v57  ;;  %v966_v25 = vadd.f32 %v1859_v52, %v1863_v46  ;;  %v889_v22 = vadd.f32 %v1833_v18, %v1871_v16  ;;  %v963_v52 = vadd.f32 %v1855_v30, %v1865_v47 }
 0x1de   : > { %1117 = vmatpush.msrb.mxu0 %v1105_v6  ;;  %1137 = vmatpush.msrb.mxu1 %v1106_v56  ;;  %v833_v56 = vadd.f32 %v832_v28, %v1865_v47  ;;  %v898_v6 = vadd.f32 %v897_v29, %v1865_v47  ;;  %v969_v28 = vadd.f32 %v968_v36, %v768_v41  ;;  %v1103_v12 = vmax.f32 %v975_v2, 0.0 }
 0x1df   : > { %v1034_v29 = vadd.f32 %v1033_v37, %v768_v41  ;;  %v1031_v36 = vadd.f32 %v1861_v53, %v1863_v46  ;;  %v1099_v37 = vmax.f32 %v972_v48, 0.0  ;;  %v1100_v41 = vmax.f32 %v1037_v7, 0.0 }
 0x1e0   : > { %v977_v38 = vpop.f32.mrf.mxu2  ;;  %v1042_v39 = vpop.f32.mrf.mxu3  ;;  %1118 = vmatpush.msrb.mxu0 %v1101_v61  ;;  %1138 = vmatpush.msrb.mxu1 %v1102_v60  ;;  %v830_v60 = vadd.f32 %v1847_v14, %v1867_v55  ;;  %v1090_v61 = vmax.f32 %v901_v44, 0.0  ;;  %v1085_v14 = vmax.f32 %v833_v56, 0.0  ;;  %v1086_v40 = vmax.f32 %v898_v6, 0.0 }
 0x1e1   : > { %v978_v62 = vadd.f32 %v977_v38, %v783_v34  ;;  %v1043_v3 = vadd.f32 %v1042_v39, %v783_v34  ;;  %v827_v34 = vadd.f32 %v1839_v21, %v1869_v57  ;;  %v824_v21 = vadd.f32 %v1831_v17, %v1871_v16  ;;  %v1897_v44 = vpop.permute.xlu1 %727 }
 0x1e2   : > { %1119 = vmatpush.msrb.mxu0 %v1097_v58  ;;  %1139 = vmatpush.msrb.mxu1 %v1098_v63  ;;  %v1081_v42 = vmax.f32 %v830_v60, 0.0  ;;  %v1082_v43 = vmax.f32 %v895_v54, 0.0  ;;  %v1028_v53 = vadd.f32 %v1857_v31, %v1865_v47  ;;  %v1095_v46 = vmax.f32 %v969_v28, 0.0  ;;  %v718_v7 = vpop.permute.xlu0 %717  ;;  %v2028_v54 = vld [vmem:[#allocation14_spill] sm:$0xff] }
 0x1e3   : > { %v1107_v51 = vmax.f32 %v978_v62, 0.0  ;;  %v1108_v45 = vmax.f32 %v1043_v3, 0.0  ;;  %v1096_v58 = vmax.f32 %v1034_v29, 0.0  ;;  %v821_v17 = vadd.f32 %v1823_v13, %v1875_v49 }
 0x1e4   : > { %1120 = vmatpush.msrb.mxu0 %v1093_v33  ;;  %1140 = vmatpush.msrb.mxu1 %v1094_v50  ;;  %v886_v18 = vadd.f32 %v1825_v15, %v1875_v49  ;;  %v1077_v63 = vmax.f32 %v827_v34, 0.0  ;;  %v1078_v38 = vmax.f32 %v892_v35, 0.0  ;;  %v1907_v39 = vpop.permute.xlu2 %722  ;;  %v960_v30 = vadd.f32 %v1851_v26, %v1867_v55  ;;  %v2031_v34 = vld [vmem:[#allocation23_spill] sm:$0xff] }
 0x1e5   : > { %1157 = vmatpush.msrb.mxu2 %v1107_v51  ;;  %1177 = vmatpush.msrb.mxu3 %v1108_v45  ;;  %v1025_v31 = vadd.f32 %v1853_v27, %v1867_v55  ;;  %v1091_v47 = vmax.f32 %v966_v25, 0.0  ;;  %v1092_v2 = vmax.f32 %v1031_v36, 0.0  ;;  %v818_v13 = vadd.f32 %v1815_v8, %v1887_v9  ;;  %v2033_v36 = vld [vmem:[#allocation11_spill] sm:$0xff] }
 0x1e6   : > { %1121 = vmatpush.msrb.mxu0 %v1089_v59  ;;  %1141 = vmatpush.msrb.mxu1 %v1090_v61  ;;  %v883_v15 = vadd.f32 %v1817_v10, %v1887_v9  ;;  %v1073_v32 = vmax.f32 %v824_v21, 0.0  ;;  %v1074_v62 = vmax.f32 %v889_v22, 0.0  ;;  %v957_v26 = vadd.f32 %v1843_v23, %v1869_v57  ;;  %v2029_v59 = vld [vmem:[#allocation15_spill] sm:$0xff] }
 0x1e7   : > { %1158 = vmatpush.msrb.mxu2 %v1103_v12  ;;  %1178 = vmatpush.msrb.mxu3 %v1104_v11  ;;  %v1022_v55 = vadd.f32 %v1845_v24, %v1869_v57  ;;  %v1087_v27 = vmax.f32 %v963_v52, 0.0  ;;  %v1088_v3 = vmax.f32 %v1028_v53, 0.0  ;;  %v815_v8 = vadd.f32 %v1807_v4, %v1897_v44  ;;  %v2030_v12 = vld [vmem:[#allocation22_spill] sm:$0xff]  ;;  %v2035_v52 = vld [vmem:[#allocation21_spill] sm:$0xff] }
 0x1e8   : > { %1122 = vmatpush.msrb.mxu0 %v1085_v14  ;;  %1142 = vmatpush.msrb.mxu1 %v1086_v40  ;;  %v880_v10 = vadd.f32 %v1809_v5, %v1897_v44  ;;  %v1069_v56 = vmax.f32 %v821_v17, 0.0  ;;  %v1070_v6 = vmax.f32 %v886_v18, 0.0  ;;  %v954_v23 = vadd.f32 %v1835_v19, %v1871_v16  ;;  %v2026_v19 = vld [vmem:[#allocation24_spill] sm:$0xff]  ;;  %v2032_v40 = vld [vmem:[#allocation10_spill] sm:$0xff]  ;;  %v2037_v18 = vld [vmem:[#allocation7_spill] sm:$0xff] }
 0x1e9   : > { %1159 = vmatpush.msrb.mxu2 %v1099_v37  ;;  %1179 = vmatpush.msrb.mxu3 %v1100_v41  ;;  %v1019_v57 = vadd.f32 %v1837_v20, %v1871_v16  ;;  %v1083_v24 = vmax.f32 %v960_v30, 0.0  ;;  %v1084_v33 = vmax.f32 %v1025_v31, 0.0  ;;  %v812_v4 = vadd.f32 %v1799_v0, %v1907_v39  ;;  %v2027_v16 = vld [vmem:[#allocation25_spill] sm:$0xff]  ;;  %v713_v29 = vpop.permute.xlu1 %712  ;;  %v2038_v31 = vld [vmem:[#allocation18_spill] sm:$0xff] }
 0x1ea   : > { %1123 = vmatpush.msrb.mxu0 %v1081_v42  ;;  %1143 = vmatpush.msrb.mxu1 %v1082_v43  ;;  %v877_v5 = vadd.f32 %v1801_v1, %v1907_v39  ;;  %v1065_v50 = vmax.f32 %v818_v13, 0.0  ;;  %v1066_v48 = vmax.f32 %v883_v15, 0.0  ;;  %v951_v51 = vadd.f32 %v2026_v19, %v1875_v49  ;;  %v2034_v42 = vld [vmem:[#allocation20_spill] sm:$0xff] }
 0x1eb   : > { %1160 = vmatpush.msrb.mxu2 %v1095_v46  ;;  %1180 = vmatpush.msrb.mxu3 %v1096_v58  ;;  %v1016_v20 = vadd.f32 %v2027_v16, %v1875_v49  ;;  %v1079_v45 = vmax.f32 %v957_v26, 0.0  ;;  %v1080_v60 = vmax.f32 %v1022_v55, 0.0  ;;  %v809_v0 = vadd.f32 %v2028_v54, %v718_v7  ;;  %v2036_v58 = vld [vmem:[#allocation6_spill] sm:$0xff]  ;;  %v2040_v26 = vld [vmem:[#allocation16_spill] sm:$0xff] }
 0x1ec   : > { %1124 = vmatpush.msrb.mxu0 %v1077_v63  ;;  %1144 = vmatpush.msrb.mxu1 %v1078_v38  ;;  %v874_v61 = vadd.f32 %v2029_v59, %v718_v7  ;;  %v1061_v1 = vmax.f32 %v815_v8, 0.0  ;;  %v1062_v28 = vmax.f32 %v880_v10, 0.0  ;;  %v948_v11 = vadd.f32 %v2030_v12, %v1887_v9  ;;  %v708_v22 = vpop.permute.xlu2 %707 }
 0x1ed   : > { %1161 = vmatpush.msrb.mxu2 %v1091_v47  ;;  %1181 = vmatpush.msrb.mxu3 %v1092_v2  ;;  %v1013_v35 = vadd.f32 %v2031_v34, %v1887_v9  ;;  %v1075_v49 = vmax.f32 %v954_v23, 0.0  ;;  %v1076_v14 = vmax.f32 %v1019_v57, 0.0  ;;  %v806_v25 = vadd.f32 %v2032_v40, %v713_v29  ;;  %v2039_v2 = vld [vmem:[#allocation19_spill] sm:$0xff]  ;;  %v2043_v57 = vld [vmem:[#allocation13_spill] sm:$0xff] }
 0x1ee   : > { %1125 = vmatpush.msrb.mxu0 %v1073_v32  ;;  %1145 = vmatpush.msrb.mxu1 %v1074_v62  ;;  %v871_v37 = vadd.f32 %v2033_v36, %v713_v29  ;;  %v1057_v41 = vmax.f32 %v812_v4, 0.0  ;;  %v1058_v21 = vmax.f32 %v877_v5, 0.0  ;;  %v945_v43 = vadd.f32 %v2034_v42, %v1897_v44  ;;  %v1109_v5 = vld [vmem:[%s2001_s5] sm:$0x1] }
 0x1ef   : > { %1162 = vmatpush.msrb.mxu2 %v1087_v27  ;;  %1182 = vmatpush.msrb.mxu3 %v1088_v3  ;;  %v1010_v53 = vadd.f32 %v2035_v52, %v1897_v44  ;;  %v1071_v9 = vmax.f32 %v951_v51, 0.0  ;;  %v1072_v46 = vmax.f32 %v1016_v20, 0.0  ;;  %v803_v17 = vadd.f32 %v2036_v58, %v708_v22  ;;  %v2041_v27 = vld [vmem:[#allocation17_spill] sm:$0xff] }
 0x1f0   : > { %1126 = vmatpush.msrb.mxu0 %v1069_v56  ;;  %1146 = vmatpush.msrb.mxu1 %v1070_v6  ;;  %v868_v63 = vadd.f32 %v2037_v18, %v708_v22  ;;  %v1053_v38 = vmax.f32 %v809_v0, 0.0  ;;  %v1054_v30 = vmax.f32 %v874_v61, 0.0  ;;  %v942_v47 = vadd.f32 %v2038_v31, %v1907_v39  ;;  %v1114_v0 = vpop.permute.xlu0 %1113 }
 0x1f1   : > { %1163 = vmatpush.msrb.mxu2 %v1083_v24  ;;  %1183 = vmatpush.msrb.mxu3 %v1084_v33  ;;  %v1007_v13 = vadd.f32 %v2039_v2, %v1907_v39  ;;  %v1067_v15 = vmax.f32 %v948_v11, 0.0  ;;  %v1068_v44 = vmax.f32 %v1013_v35, 0.0  ;;  %v1049_v32 = vmax.f32 %v806_v25, 0.0  ;;  %v2042_v39 = vld [vmem:[#allocation12_spill] sm:$0xff] }
 0x1f2   : > { %1127 = vmatpush.msrb.mxu0 %v1065_v50  ;;  %1147 = vmatpush.msrb.mxu1 %v1066_v48  ;;  %v1050_v62 = vmax.f32 %v871_v37, 0.0  ;;  %v939_v55 = vadd.f32 %v2040_v26, %v718_v7  ;;  %v1004_v3 = vadd.f32 %v2041_v27, %v718_v7  ;;  %v1063_v8 = vmax.f32 %v945_v43, 0.0  ;;  %v2044_v50 = vld [vmem:[#allocation8_spill] sm:$0xff]  ;;  %v2045_v7 = vld [vmem:[#allocation9_spill] sm:$0xff] }
 0x1f3   : > { %1164 = vmatpush.msrb.mxu2 %v1079_v45  ;;  %1184 = vmatpush.msrb.mxu3 %v1080_v60  ;;  %v1064_v10 = vmax.f32 %v1010_v53, 0.0  ;;  %v1045_v56 = vmax.f32 %v803_v17, 0.0  ;;  %v1046_v6 = vmax.f32 %v868_v63, 0.0  ;;  %v936_v23 = vadd.f32 %v2042_v39, %v713_v29 }
 0x1f4   : > { %1128 = vmatpush.msrb.mxu0 %v1061_v1  ;;  %1148 = vmatpush.msrb.mxu1 %v1062_v28  ;;  %v1001_v24 = vadd.f32 %v2043_v57, %v713_v29  ;;  %v1059_v33 = vmax.f32 %v942_v47, 0.0  ;;  %v1060_v4 = vmax.f32 %v1007_v13, 0.0  ;;  %v933_v48 = vadd.f32 %v2044_v50, %v708_v22 }
 0x1f5   : > { %1165 = vmatpush.msrb.mxu2 %v1075_v49  ;;  %1185 = vmatpush.msrb.mxu3 %v1076_v14  ;;  %v998_v19 = vadd.f32 %v2045_v7, %v708_v22  ;;  %v1055_v51 = vmax.f32 %v939_v55, 0.0  ;;  %v1056_v16 = vmax.f32 %v1004_v3, 0.0  ;;  %v1051_v20 = vmax.f32 %v936_v23, 0.0 }
 0x1f6   : > { %1129 = vmatpush.msrb.mxu0 %v1057_v41  ;;  %1149 = vmatpush.msrb.mxu1 %v1058_v21  ;;  %v1052_v45 = vmax.f32 %v1001_v24, 0.0  ;;  %v1047_v60 = vmax.f32 %v933_v48, 0.0  ;;  %v1116_v61 = vperm.slane %v1114_v0, 0  ;;  %v1211_v11 = vlaneseq }
 0x1f7   : > { %1166 = vmatpush.msrb.mxu2 %v1071_v9  ;;  %1186 = vmatpush.msrb.mxu3 %v1072_v46  ;;  %v1048_v54 = vmax.f32 %v998_v19, 0.0 }
 0x1f8   : > { %1130 = vmatpush.msrb.mxu0 %v1053_v38  ;;  %1150 = vmatpush.msrb.mxu1 %v1054_v30  ;;  %vm1213_vm3 = vcmp.lt.s32.totalorder %v1211_v11, 512 }
 0x1f9   : > { %1167 = vmatpush.msrb.mxu2 %v1067_v15  ;;  %1187 = vmatpush.msrb.mxu3 %v1068_v44 }
 0x1fa   : > { %1131 = vmatpush.msrb.mxu0 %v1049_v32  ;;  %1151 = vmatpush.msrb.mxu1 %v1050_v62 }
 0x1fb   : > { %1168 = vmatpush.msrb.mxu2 %v1063_v8  ;;  %1188 = vmatpush.msrb.mxu3 %v1064_v10 }
 0x1fc   : > { %1132 = vmatpush.msrb.mxu0 %v1045_v56  ;;  %1152 = vmatpush.msrb.mxu1 %v1046_v6 }
 0x1fd   : > { %1169 = vmatpush.msrb.mxu2 %v1059_v33  ;;  %1189 = vmatpush.msrb.mxu3 %v1060_v4 }
 0x1fe   : > { %1133 = vmatmul.f32.vlgmr.msrb.gmra.mxu0 %v1109_v5  ;;  %1153 = vmatmul.f32.vlgmr.msrb.gmra.mxu1 %v1109_v5 }
 0x1ff   : > { %1170 = vmatpush.msrb.mxu2 %v1055_v51  ;;  %1190 = vmatpush.msrb.mxu3 %v1056_v16 }
 0x201   : > { %1171 = vmatpush.msrb.mxu2 %v1051_v20  ;;  %1191 = vmatpush.msrb.mxu3 %v1052_v45 }
 0x203   : > { %1172 = vmatpush.msrb.mxu2 %v1047_v60  ;;  %1192 = vmatpush.msrb.mxu3 %v1048_v54 }
 0x204   : > { %1173 = vmatmul.f32.vlgmr.msrb.gmra.mxu2 %v1109_v5  ;;  %1193 = vmatmul.f32.vlgmr.msrb.gmra.mxu3 %v1109_v5 }
 0x27b   : > { %v1154_v59 = vpop.f32.mrf.mxu1  ;;  %v1134_v28 = vpop.f32.mrf.mxu0 }
 0x27c   : > { %v1155_v1 = vadd.f32 %v1154_v59, %v1116_v61  ;;  %v1135_v14 = vadd.f32 %v1134_v28, %v1116_v61 }
 0x27e   : > { %v1201_v34 = vrot.slane %v1155_v1, 7 }
 0x280   : > { %v1205_v36 = vsel %vm1204_vm0, %v1135_v14, %v1201_v34 }
 0x287   : > { %v1174_v29 = vpop.f32.mrf.mxu2  ;;  %v1194_v12 = vpop.f32.mrf.mxu3 }
 0x288   : > { %v1175_v35 = vadd.f32 %v1174_v29, %v1116_v61  ;;  %v1195_v49 = vadd.f32 %v1194_v12, %v1116_v61 }
 0x28a   : > { %v1202_v40 = vrot.slane %v1175_v35, 6  ;;  %v1203_v25 = vrot.slane %v1195_v49, 5 }
 0x28c   : > { %v1207_v37 = vsel %vm1206_vm1, %v1202_v40, %v1203_v25 }
 0x28d   : > { %v1209_v41 = vsel %vm1208_vm2, %v1205_v36, %v1207_v37 }
 0x28e   : > { %1215 = vst.msk [vmem:[%s272_s19] sm:$0xf] %vm1213_vm3, %v1209_v41 }
 0x28f   : > { %1368 = shalt.err (!%p1365_p3)
}
 0x290   : > { %1298 = dma.vmem_to_hbm [thread:$0]  (%p1486_p5), %s1230_s20, 64, %s1232_s21, %s1217_s17  }
 0x291 PF: > { %p1304_p4 = scmp.ge.s32.totalorder %s1403_s29, 2  ;;  %s1243_s10 = sand.u32 1, %s1391_s26  }
 0x292   : > { %s1244_s14 = scalar_lea.sflag [#allocation4], %s1243_s10 }
 0x293   : > { %p1301_p7 = pnand %p1304_p4, %p1490_p6 }
 0x295   : > { %p1302_p8 = pneg %p1301_p7 }
 0x297   : > { %1386 = dma.done.wait (%p1302_p8), %s1244_s14, 64  }
 0x298   : > { %1388 = vsyncadd (%p1302_p8), %s1244_s14, 4294967232  ;;  %p19_p9 = scmp.ge.s32.totalorder %s1472_s8, 4   ;;  %s2046_s26 = smov %s1395_s27 }
 0x299   : > { %s2047_s27 = smov %s1399_s28  ;;  %s2048_s28 = smov %s1484_s11 }
 0x29a   : > { %s2049_s29 = smov %s1472_s8  ;;  %21 = sbr.rel (!%p19_p9) target bundleno = 6 (0x6), region = 83 }
 0x29f   :  { %1250 = vsyncpa [#allocation4], 1 }
 0x2a0   :  { %1252 = vsyncpa [#allocation4 + $0x1], 1 }

</bundles_post_ra>
